<compile_context>
chip_gen: v7x
topology: tpu7x:2x2x1
jax: 0.10.0
libtpu: 0.0.40
codegen_flags: <defaults>
</compile_context>

<pallas_src>
import functools

import jax
import jax.numpy as jnp
from jax.experimental import pallas as pl
from jax.experimental.pallas import tpu as pltpu

_LANES = 128
_DEFAULT_BLOCK_ROWS = 8192      # f32: 8192 x 128 x 4B = 4 MiB per buffer
_VMEM_FLOOR = 32 << 20
_VMEM_CEIL = 48 << 20           # stays under v7x's 64 MiB physical VMEM


def _sublane_multiple(dtype) -> int:
    # Packed-sublane tile: f32 -> 8, bf16/f16 -> 16, int8/fp8 -> 32.
    itemsize = jnp.dtype(dtype).itemsize
    return 8 * max(1, 4 // itemsize)


def _round_up(a: int, m: int) -> int:
    return ((a + m - 1) // m) * m


def _is_on_tpu(x) -> bool:
    # Dispatch on the device x actually lives on; fall back to the default
    # backend when that is not observable (e.g. under tracing).
    try:
        return any(d.platform == "tpu" for d in x.devices())
    except Exception:
        return jax.default_backend() == "tpu"


def _prng_noise_kernel(seed_ref, x_ref, o_ref, *, std):
    # On-chip PRNG path (real TPU).  Per-block seed so each tile draws
    # independent noise.  Add is done in x's dtype; only the noise is scaled
    # in f32 and cast down (no f32 upcast of x).
    pltpu.prng_seed(seed_ref[0], pl.program_id(0))
    noise = pltpu.stateful_normal(x_ref.shape, jnp.float32)
    o_ref[...] = x_ref[...] + (noise * std).astype(o_ref.dtype)


def _noise_add_kernel(noise_ref, x_ref, o_ref, *, std):
    # Portable fallback path: standard-normal noise precomputed in the wrapper
    # (used where pltpu.prng_seed has no lowering, e.g. CPU interpret tests).
    o_ref[...] = x_ref[...] + (noise_ref[...] * std).astype(o_ref.dtype)


def _launch(x2d, seed, std, block_rows, on_tpu):
    """Run the noise-add kernel over a lane-dense (rows, 128) slab."""
    rows, _ = x2d.shape
    dtype = x2d.dtype
    sub = _sublane_multiple(dtype)
    itemsize = jnp.dtype(dtype).itemsize

    br = min(int(block_rows), rows)
    # Keep >=2 grid blocks when the row count allows it, so the "parallel"
    # axis can shard across the two TensorCores on v7x (no-op on v5e/v6e).
    if rows >= 2 * sub:
        br = min(br, max(sub, _round_up(pl.cdiv(rows, 2), sub)))
    br = max(sub, _round_up(br, sub))
    br = min(br, rows)

    grid = (pl.cdiv(rows, br),)
    data_spec = pl.BlockSpec((br, _LANES), lambda i: (i, 0))
    out_shape = jax.ShapeDtypeStruct((rows, _LANES), dtype)

    n_elems = rows * _LANES
    cost = pl.CostEstimate(
        flops=2 * n_elems,
        transcendentals=(3 * n_elems) if on_tpu else 0,
        bytes_accessed=(2 if on_tpu else 3) * n_elems * itemsize,
    )

    # VMEM budget: double-buffered in + out blocks plus in-kernel f32 temps
    # (noise array + scaled copy), with 1.5x headroom.
    n_io_bufs = 4 if on_tpu else 6
    io_bytes = n_io_bufs * br * _LANES * itemsize
    tmp_bytes = 2 * br * _LANES * 4
    vmem_limit = int(min(_VMEM_CEIL, max(_VMEM_FLOOR, (io_bytes + tmp_bytes) * 3 // 2)))

    if on_tpu:
        seed_arr = jnp.asarray([seed], dtype=jnp.int32)
        return pl.pallas_call(
            functools.partial(_prng_noise_kernel, std=std),
            out_shape=out_shape,
            grid=grid,
            in_specs=[
                pl.BlockSpec(memory_space=pltpu.MemorySpace.SMEM),  # seed scalar
                data_spec,                                          # x tile
            ],
            out_specs=data_spec,
            cost_estimate=cost,
            compiler_params=pltpu.CompilerParams(
                dimension_semantics=("parallel",),
                has_side_effects=True,
                vmem_limit_bytes=vmem_limit,
            ),
        )(seed_arr, x2d)

    # TODO(synk): on non-TPU backends pltpu.prng_seed has no lowering, so the
    # standard-normal draw happens in the wrapper (one extra HBM pass).
    key = jax.random.PRNGKey(int(seed))
    noise2d = jax.random.normal(key, (rows, _LANES), dtype=jnp.float32)
    return pl.pallas_call(
        functools.partial(_noise_add_kernel, std=std),
        out_shape=out_shape,
        grid=grid,
        in_specs=[data_spec, data_spec],
        out_specs=data_spec,
        cost_estimate=cost,
    )(noise2d, x2d)


def gaussian_noise(x, seed, std=0.1, training=True, block_rows=_DEFAULT_BLOCK_ROWS):
    """Pallas equivalent of GaussianNoise.forward."""
    if (not training) or std == 0.0:
        # eval path: exact identity, like the PyTorch module.
        return x

    orig_shape = x.shape
    dtype = x.dtype
    n = x.size
    std = float(std)

    sub = _sublane_multiple(dtype)
    chunk = sub * _LANES
    on_tpu = _is_on_tpu(x)

    flat = x.reshape(-1)

    if n < chunk:
        # Tiny input: padding to a single aligned tile is negligible here.
        padded = jnp.pad(flat, (0, chunk - n))
        out2d = _launch(padded.reshape(sub, _LANES), seed, std, block_rows, on_tpu)
        return out2d.reshape(-1)[:n].reshape(orig_shape)

    # Largest lane/sublane-aligned prefix goes through the kernel with no
    # pad / slice-back passes; the (< sub*128 element) tail uses plain jnp.
    n_main = (n // chunk) * chunk
    rows_main = n_main // _LANES
    out_main = _launch(
        flat[:n_main].reshape(rows_main, _LANES), seed, std, block_rows, on_tpu
    ).reshape(-1)

    if n_main == n:
        return out_main.reshape(orig_shape)

    tail = flat[n_main:]
    tail_key = jax.random.fold_in(jax.random.PRNGKey(int(seed)), n_main)
    tail_noise = jax.random.normal(tail_key, tail.shape, dtype=jnp.float32)
    tail_out = (tail.astype(jnp.float32) + std * tail_noise).astype(dtype)
    # TODO(synk): one concatenate copy remains on non-aligned shapes; a fully
    # in-place tail would need a masked 1-D final block.
    return jnp.concatenate([out_main, tail_out]).reshape(orig_shape)


if __name__ == "__main__":
    key = jax.random.PRNGKey(0)
    # NCHW input, small shapes: batch=2, channels=4, spatial=16x16.
    x = jax.random.normal(key, (2, 4, 16, 16), dtype=jnp.float32)

    std = 0.1
    y = gaussian_noise(x, seed=1234, std=std, training=True)
    y = jax.block_until_ready(y)

    # Shape/dtype preserved; noise is nonzero and of reasonable magnitude.
    assert y.shape == x.shape and y.dtype == x.dtype
    diff = y - x
    assert float(jnp.max(jnp.abs(diff))) > 0.0           # noise was added
    assert 0.0 < float(jnp.std(diff)) < 5.0 * std        # ~N(0, std^2)
    assert abs(float(jnp.mean(diff))) < 5.0 * std        # roughly zero-mean

    # Eval mode is exact identity.
    y_eval = gaussian_noise(x, seed=1234, std=std, training=False)
    assert bool(jnp.all(y_eval == x))

    # Exercise the tiny / non-divisible path too: 3*5*7 elements.
    x_odd = jax.random.normal(jax.random.PRNGKey(1), (3, 5, 7), dtype=jnp.float32)
    y_odd = jax.block_until_ready(gaussian_noise(x_odd, seed=7, std=std))
    assert y_odd.shape == x_odd.shape
    assert float(jnp.max(jnp.abs(y_odd - x_odd))) > 0.0

    # Exercise the aligned-prefix + tail path: 1025*3 elements (> 1 chunk,
    # not a multiple of 1024).
    x_tail = jax.random.normal(jax.random.PRNGKey(2), (1025, 3), dtype=jnp.float32)
    y_tail = jax.block_until_ready(gaussian_noise(x_tail, seed=9, std=std))
    assert y_tail.shape == x_tail.shape
    d_tail = y_tail - x_tail
    assert float(jnp.max(jnp.abs(d_tail))) > 0.0
    assert 0.0 < float(jnp.std(d_tail)) < 5.0 * std

    print("KERNEL_OK")
</pallas_src>

<mosaic_0001>
module attributes {stable_mosaic.version = 11 : i64} {
  func.func @_noise_add_kernel(%arg0: i32, %arg1: memref<8x128xf32, #tpu.memory_space<vmem>>, %arg2: memref<8x128xf32, #tpu.memory_space<vmem>>, %arg3: memref<8x128xf32, #tpu.memory_space<vmem>>) attributes {dimension_semantics = [#tpu.dimension_semantics<arbitrary>], iteration_bounds = array<i64: 2>, scalar_prefetch = 0 : i64, scratch_operands = 0 : i64, tpu.core_type = #tpu.core_type<tc>, window_params = [{transform_indices = @transform_0, window_bounds = array<i64: 8, 128>}, {transform_indices = @transform_1, window_bounds = array<i64: 8, 128>}, {transform_indices = @transform_2, window_bounds = array<i64: 8, 128>}]} {
    %c0 = arith.constant 0 : index
    %c0_0 = arith.constant 0 : index
    %0 = vector.load %arg2[%c0, %c0_0] : memref<8x128xf32, #tpu.memory_space<vmem>>, vector<8x128xf32>
    %c0_1 = arith.constant 0 : index
    %c0_2 = arith.constant 0 : index
    %1 = vector.load %arg1[%c0_1, %c0_2] : memref<8x128xf32, #tpu.memory_space<vmem>>, vector<8x128xf32>
    %cst = arith.constant 1.000000e-01 : f32
    %2 = vector.broadcast %cst : f32 to vector<8x128xf32>
    %3 = arith.mulf %1, %2 : vector<8x128xf32>
    %4 = arith.addf %0, %3 : vector<8x128xf32>
    %c0_3 = arith.constant 0 : index
    %c0_4 = arith.constant 0 : index
    %5 = vector.load %arg3[%c0_3, %c0_4] : memref<8x128xf32, #tpu.memory_space<vmem>>, vector<8x128xf32>
    tpu.vector_store %arg3[%c0_3, %c0_4], %4 {strides = array<i32>} : memref<8x128xf32, #tpu.memory_space<vmem>>, vector<8x128xf32>,
    return
  }
  func.func @transform_0(%arg0: i32) -> (i32, i32) {
    %c0_i32 = arith.constant 0 : i32
    %c0_i32_0 = arith.constant 0 : i32
    return %arg0, %c0_i32 : i32, i32
  }
  func.func @transform_1(%arg0: i32) -> (i32, i32) {
    %c0_i32 = arith.constant 0 : i32
    %c0_i32_0 = arith.constant 0 : i32
    return %arg0, %c0_i32 : i32, i32
  }
  func.func @transform_2(%arg0: i32) -> (i32, i32) {
    %c0_i32 = arith.constant 0 : i32
    %c0_i32_0 = arith.constant 0 : i32
    return %arg0, %c0_i32 : i32, i32
  }
}

</mosaic_0001>

<bundles_post_ra>
// kernel: tpu_custom_call.1
= control target key start
LH: loop header
LB: loop body
LE: loop exit
PB: predicated region body
PF: predicated region fallthrough
CT: control target
= control target key end

     0   :  { %7 = vsyncpa [#allocation3], 0  ;;  %s733_s0 = inlined_call_operand.hbm [shape: f32[16,128], index: 0, kind: input, shape index: {}]   ;;  %s734_s1 = inlined_call_operand.hbm [shape: f32[16,128], index: 1, kind: input, shape index: {}]   ;;  %s735_s2 = inlined_call_operand.hbm [shape: f32[16,128], index: 2, kind: output, shape index: {}]  }
   0x1   :  { %9 = vsyncpa [#allocation3 + $0x1], 0 }
   0x2   :  { %10 = vsyncpa [#allocation6], 0 }
   0x3   :  { %12 = vsyncpa [#allocation6 + $0x1], 0 }
   0x4   :  { %13 = vsyncpa [#allocation4], 0 }
   0x5   :  { %15 = vsyncpa [#allocation4 + $0x1], 0  ;;  %s524_s9 = smov 0   ;;  %s526_s10 = smov 0  }
   0x6   :  { %s528_s11 = smov 0   ;;  %s530_s12 = smov 0  }
   0x7 LB: > { %s545_s13 = sadd.s32 4294967295, %s504_s12   ;;  %s308_s14 = sadd.s32 4294967294, %s504_s12   ;;  %s504_s12 = sphi %s530_s12, %s754_s12   ;;  %s500_s11 = sphi %s528_s11, %s753_s11   ;;  %s496_s10 = sphi %s526_s10, %s752_s10   ;;  %s492_s9 = sphi %s524_s9, %s751_s9  }
   0x8   : > { %s549_s15 = sadd.s32 1, %s504_s12   ;;  %s28_s16 = sadd.s32 1, %s500_s11 }
   0x9   : > { %s25_s17 = ssub.s32 %s504_s12, %s549_s15  ;;  %p35_p0 = scmp.ne.s32.totalorder %s500_s11, %s496_s10 }
   0xa   : > { %p26_p1 = scmp.eq.s32.totalorder %s25_s17, 0  ;;  %p36_p2 = scmp.eq.s32.totalorder %s504_s12, 0 }
   0xb   : > { %p41_p3 = scmp.ne.s32.totalorder %s496_s10, %s492_s9  ;;  %p42_p4 = scmp.eq.s32.totalorder %s545_s13, 0 }
   0xc   : > { %s561_s18 = scalar_select %p26_p1, %s500_s11, %s28_s16  }
   0xd   : > { %p563_p5 = por %p36_p2, %p35_p0  ;;  %p567_p6 = por %p42_p4, %p41_p3 }
   0xe   : > { %p91_p7 = scmp.eq.s32.totalorder %s545_s13, 1  ;;  %p97_p8 = scmp.eq.s32.totalorder %s308_s14, 1 }
   0xf   : > { %s739_s20 = scalar_select %p567_p6, 1, 0 }
  0x10   : > { %p340_p10 = scmp.lt.s32.totalorder %s504_s12, 2  ;;  %p574_p11 = por %p91_p7, %p35_p0 }
  0x11   : > { %p578_p12 = por %p97_p8, %p41_p3  ;;  %s583_s23 = sand.u32 1, %s500_s11  }
  0x12   : > { %s740_s21 = scalar_select %p574_p11, 1, 0 }
  0x13   : > { %s741_s22 = scalar_select %p578_p12, 1, 0 }
  0x14   : > { %s312_s24 = sshll.u32 %s504_s12, 7  ;;  %s311_s25 = sshll.u32 %s583_s23, 3 }
  0x15   : > { %s592_s28 = scalar_lea.hbm %s733_s0, %s312_s24  ;;  %s121_s29 = scalar_lea.vmem [#allocation2], %s311_s25 }
  0x16   : > { %s128_s30 = sshll.u32 %s121_s29, 4  ;;  %p598_p13 = pnand %p340_p10, %p563_p5  ;;  %s602_s30 = int_to_ptr.vmem [resolvable:$true] %s128_s30 }
  0x17   : > { %s118_s4 = scalar_lea.sflag [#allocation3], %s583_s23  ;;  %s374_s5 = scalar_lea.hbm %s592_s28, 128 }
  0x18   : > { %p375_p2 = scmp.ne.s32.totalorder %s592_s28, %s374_s5  ;;  %p376_p3 = pneg %p598_p13 }
  0x19   : > { %s379_s8 = scalar_lea.hbm %s733_s0, 256  ;;  %p380_p5 = scmp.lt.u32.totalorder %s592_s28, %s733_s0 }
  0x1a   : > { %p377_p4 = pnand %p376_p3, %p375_p2  ;;  %p381_p8 = scmp.lt.u32.totalorder %s379_s8, %s374_s5 }
  0x1b   : > { %p383_p9 = scmp.lt.u32.totalorder %s374_s5, %s592_s28 }
  0x1c   : > { %p378_p7 = pneg %p377_p4  ;;  %p382_p10 = por %p381_p8, %p380_p5 }
  0x1e   : > { %p384_p0 = por %p383_p9, %p382_p10 }
  0x20   : > { %p385_p1 = pnand %p384_p0, %p378_p7 }
  0x22   : > { %388 = shalt.err (!%p385_p1)
}
  0x23   : > { %s389_s17 = scalar_lea.vmem %s602_s30, 128  ;;  %s506_s19 = smov [#allocation2]  }
  0x24   : > { %p390_p2 = scmp.ne.s32.totalorder %s602_s30, %s389_s17  ;;  %s394_s26 = sshll.u32 %s506_s19, 4  ;;  %s395_s26 = int_to_ptr.vmem [resolvable:$false] %s394_s26 }
  0x25   : > { %s396_s27 = scalar_lea.vmem %s395_s26, 256  ;;  %p397_p11 = scmp.lt.s32.totalorder %s602_s30, %s395_s26 }
  0x26   : > { %p392_p4 = pnand %p390_p2, %p376_p3  ;;  %p398_p5 = scmp.lt.s32.totalorder %s396_s27, %s389_s17 }
  0x28   : > { %p393_p12 = pneg %p392_p4  ;;  %p399_p8 = por %p398_p5, %p397_p11 }
  0x2a   : > { %p400_p9 = pnand %p399_p8, %p393_p12 }
  0x2c   : > { %403 = shalt.err (!%p400_p9)
}
  0x2d   : > { %332 = dma.hbm_to_vmem [thread:$0]  (!%p598_p13), %s592_s28, 128, %s602_s30, %s118_s4  }
  0x2e   : > { %p743_p0 = scmp.lt.s32.totalorder %s504_s12, 3  ;;  %p744_p1 = scmp.ge.s32.totalorder %s504_s12, 1 }
  0x2f   : > { %s645_s7 = scalar_lea.hbm %s734_s1, %s312_s24  ;;  %s139_s8 = scalar_lea.vmem [#allocation5], %s311_s25 }
  0x30   : > { %p636_p7 = pnand %p744_p1, %p743_p0  ;;  %s146_s14 = sshll.u32 %s139_s8, 4  ;;  %s147_s14 = int_to_ptr.vmem [resolvable:$true] %s146_s14 }
  0x31   : > { %s136_s28 = scalar_lea.sflag [#allocation6], %s583_s23  ;;  %s404_s30 = scalar_lea.hbm %s645_s7, 128 }
  0x32   : > { %s745_s29 = scalar_select %p636_p7, 1, 0 }
  0x33   : > { %p405_p11 = scmp.ne.s32.totalorder %s645_s7, %s404_s30  ;;  %s409_s24 = scalar_lea.hbm %s734_s1, 256 }
  0x34   : > { %p410_p2 = scmp.lt.u32.totalorder %s645_s7, %s734_s1  ;;  %p411_p4 = scmp.lt.u32.totalorder %s409_s24, %s404_s30 }
  0x35   : > { %p407_p12 = pnand %p405_p11, %p376_p3  ;;  %p413_p8 = scmp.lt.u32.totalorder %s404_s30, %s645_s7 }
  0x36   : > { %p412_p5 = por %p411_p4, %p410_p2 }
  0x37   : > { %p408_p10 = pneg %p407_p12 }
  0x38   : > { %p414_p9 = por %p413_p8, %p412_p5 }
  0x3a   : > { %p415_p0 = pnand %p414_p9, %p408_p10 }
  0x3c   : > { %418 = shalt.err (!%p415_p0)
}
  0x3d   : > { %s419_s23 = scalar_lea.vmem %s147_s14, 128  ;;  %s507_s25 = smov [#allocation5]  }
  0x3e   : > { %p420_p1 = scmp.ne.s32.totalorder %s147_s14, %s419_s23  ;;  %s424_s26 = sshll.u32 %s507_s25, 4  ;;  %s425_s26 = int_to_ptr.vmem [resolvable:$false] %s424_s26 }
  0x3f   : > { %s426_s27 = scalar_lea.vmem %s425_s26, 256  ;;  %p427_p6 = scmp.lt.s32.totalorder %s147_s14, %s425_s26 }
  0x40   : > { %p422_p11 = pnand %p420_p1, %p376_p3  ;;  %p428_p7 = scmp.lt.s32.totalorder %s426_s27, %s419_s23 }
  0x42   : > { %p423_p12 = pneg %p422_p11  ;;  %p429_p2 = por %p428_p7, %p427_p6 }
  0x44   : > { %p430_p4 = pnand %p429_p2, %p423_p12 }
  0x46   : > { %433 = shalt.err (!%p430_p4)
}
  0x47   : > { %335 = dma.hbm_to_vmem [thread:$0]  (!%p598_p13), %s645_s7, 128, %s147_s14, %s136_s28  }
  0x48   : > { %p746_p10 = scmp.ne.s32.totalorder %s745_s29, 0 }
  0x49   : > { %s672_s5 = sand.u32 (!%p746_p10), 1, %s496_s10   ;;  %p747_p3 = scmp.ne.s32.totalorder (!%p746_p10), %s739_s20, 0 }
  0x4a   : > { %155 = sbr.rel (%p746_p10) target bundleno = 110 (0x6e), region = 28  ;;  %s316_s6 = sshll.u32 (!%p746_p10), %s672_s5, 3 }
  0x4b   : > { %s158_s8 = scalar_lea.sflag (!%p746_p10), [#allocation3], %s672_s5  ;;  %s161_s30 = scalar_lea.vmem (!%p746_p10), [#allocation2], %s316_s6 }
  0x51   : > { %479 = dma.done.wait (%p747_p3), %s158_s8, 128  }
  0x52   : > { %481 = vsyncadd (%p747_p3), %s158_s8, 4294967168  ;;  %s167_s3 = scalar_lea.sflag [#allocation6], %s672_s5  ;;  %s170_s7 = scalar_lea.vmem [#allocation5], %s316_s6 }
  0x53   : > { %483 = dma.done.wait (%p747_p3), %s167_s3, 128  }
  0x54   : > { %485 = vsyncadd (%p747_p3), %s167_s3, 4294967168  ;;  %v196_v0 = vld [vmem:[%s170_s7] sm:$0xff]  ;;  %v197_v1 = vld [vmem:[%s161_s30] sm:$0xff]  ;;  %s195_s29 = scalar_lea.vmem [#allocation7], %s316_s6  ;;  %s320_s28 = sshll.u32 %s545_s13, 7 }
  0x55   : > { %s215_s14 = sshll.u32 %s195_s29, 4  ;;  %v198_v2 = vmul.f32 0.1, %v197_v1  ;;  %s691_s20 = scalar_lea.hbm %s735_s2, %s320_s28  ;;  %s686_s14 = int_to_ptr.vmem [resolvable:$true] %s215_s14 }
  0x56   : > { %s202_s24 = scalar_lea.sflag [#allocation4], %s672_s5  ;;  %s434_s17 = scalar_lea.vmem %s686_s14, 128 }
  0x57   : > { %v199_v3 = vadd.f32 %v198_v2, %v196_v0  ;;  %p435_p6 = scmp.ne.s32.totalorder %s686_s14, %s434_s17  ;;  %p748_p13 = scmp.ne.s32.totalorder %s740_s21, 0 }
  0x58   : > { %s508_s13 = smov [#allocation7]  }
  0x59   : > { %200 = vst [vmem:[%s195_s29] sm:$0xff] %v199_v3  ;;  %p436_p7 = pnand %p435_p6, %p748_p13  ;;  %s438_s19 = sshll.u32 %s508_s13, 4  ;;  %s439_s19 = int_to_ptr.vmem [resolvable:$false] %s438_s19 }
  0x5a   : > { %s440_s23 = scalar_lea.vmem %s439_s19, 256  ;;  %p441_p8 = scmp.lt.s32.totalorder %s686_s14, %s439_s19 }
  0x5b   : > { %p437_p5 = pneg %p436_p7  ;;  %p442_p9 = scmp.lt.s32.totalorder %s440_s23, %s434_s17 }
  0x5d   : > { %p443_p0 = por %p442_p9, %p441_p8 }
  0x5f   : > { %p444_p1 = pnand %p443_p0, %p437_p5 }
  0x61   : > { %447 = shalt.err (!%p444_p1)
}
  0x62   : > { %s448_s25 = scalar_lea.hbm %s691_s20, 128  ;;  %s452_s5 = scalar_lea.hbm %s735_s2, 256 }
  0x63   : > { %p449_p11 = scmp.ne.s32.totalorder %s691_s20, %s448_s25  ;;  %p453_p4 = scmp.lt.u32.totalorder %s691_s20, %s735_s2 }
  0x64   : > { %p454_p10 = scmp.lt.u32.totalorder %s452_s5, %s448_s25  ;;  %p456_p6 = scmp.lt.u32.totalorder %s448_s25, %s691_s20 }
  0x65   : > { %p450_p12 = pnand %p449_p11, %p748_p13 }
  0x66   : > { %p455_p3 = por %p454_p10, %p453_p4 }
  0x67   : > { %p451_p2 = pneg %p450_p12 }
  0x68   : > { %p457_p7 = por %p456_p6, %p455_p3 }
  0x6a   : > { %p458_p5 = pnand %p457_p7, %p451_p2 }
  0x6c   : > { %461 = shalt.err (!%p458_p5)
}
  0x6d   : > { %327 = dma.vmem_to_hbm [thread:$0]  (%p748_p13), %s686_s14, 128, %s691_s20, %s202_s24  }
  0x6e PF: > { %s227_s30 = sand.u32 1, %s492_s9   ;;  %p749_p8 = scmp.ne.s32.totalorder %s741_s22, 0 }
  0x6f   : > { %p750_p9 = scmp.ge.s32.totalorder %s504_s12, 2  ;;  %s228_s3 = scalar_lea.sflag [#allocation4], %s227_s30 }
  0x71   : > { %p337_p0 = pnand %p750_p9, %p749_p8 }
  0x73   : > { %487 = dma.done.wait (!%p337_p0), %s228_s3, 128  }
  0x74   : > { %489 = vsyncadd (!%p337_p0), %s228_s3, 4294967168  ;;  %p18_p1 = scmp.ge.s32.totalorder %s549_s15, 4   ;;  %s751_s9 = smov %s496_s10 }
  0x75   : > { %s752_s10 = smov %s500_s11  ;;  %s753_s11 = smov %s561_s18 }
  0x76   : > { %s754_s12 = smov %s549_s15  ;;  %20 = sbr.rel (!%p18_p1) target bundleno = 7 (0x7), region = 86 }
  0x7d   :  { %233 = vsyncpa [#allocation3], 1 }
  0x7e   :  { %235 = vsyncpa [#allocation3 + $0x1], 1 }
  0x7f   :  { %236 = vsyncpa [#allocation6], 1 }
  0x80   :  { %238 = vsyncpa [#allocation6 + $0x1], 1 }
  0x81   :  { %239 = vsyncpa [#allocation4], 1 }
  0x82   :  { %241 = vsyncpa [#allocation4 + $0x1], 1 }

</bundles_post_ra>
